<compile_context>
chip_gen: v7x
topology: tpu7x:2x2x1
jax: 0.10.0
libtpu: 0.0.40
codegen_flags: <defaults>
</compile_context>

<pallas_src>
import jax
import jax.numpy as jnp
from jax import lax
from jax.experimental import pallas as pl
from jax.experimental.pallas import tpu as pltpu


def _make_softmax_body_kernel(temperature: float, a_total: int, lane_tile: int):
    needs_mask = (a_total % lane_tile) != 0

    def kernel(x_ref, g_ref, act_ref, best_key_ref, best_idx_ref):
        i = pl.program_id(0)
        bsz, tile_a = x_ref.shape

        @pl.when(i == 0)
        def _init():
            best_key_ref[...] = jnp.full((bsz, 1), -jnp.inf, jnp.float32)
            best_idx_ref[...] = jnp.zeros((bsz, 1), jnp.int32)

        # ---- scaled logits for this column tile (all B rows present) -------
        z = x_ref[...].astype(jnp.float32) * temperature            # (B, TA)

        # ---- column softmax (dim 0), numerically stable ---------------------
        m = jnp.max(z, axis=0, keepdims=True)                       # (1, TA)
        e = jnp.exp(z - m)                                          # (B, TA) only per-element transcendental
        inv_s = 1.0 / jnp.sum(e, axis=0, keepdims=True)             # (1, TA) per-column, cheap

        # ---- exponential-race sampling keys ---------------------------------
        # keys[b,a] = probs[b,a] * (1/E[b,a]); per-row argmax ~ multinomial(1)
        keys = (e * inv_s) * g_ref[...]                             # (B, TA)

        # global column indices of this tile (also the argmax candidates)
        col = lax.broadcasted_iota(jnp.int32, (bsz, tile_a), 1) + i * lane_tile

        if needs_mask:
            # tail tile of a non-divisible grid: ignore padded columns
            keys = jnp.where(col < a_total, keys, -jnp.inf)

        # ---- per-row argmax within this tile --------------------------------
        tile_max = jnp.max(keys, axis=1, keepdims=True)             # (B, 1)
        cand = jnp.where(keys >= tile_max, col, jnp.int32(a_total))
        tile_idx = jnp.min(cand, axis=1, keepdims=True)             # (B, 1)

        # ---- merge into the running per-row best -----------------------------
        better = tile_max > best_key_ref[...]
        best_idx_ref[...] = jnp.where(better, tile_idx, best_idx_ref[...])
        best_key_ref[...] = jnp.where(better, tile_max, best_key_ref[...])

        @pl.when(i == pl.num_programs(0) - 1)
        def _finalize():
            act_ref[...] = best_idx_ref[...]

    return kernel


def softmax_body(outputs: jax.Array, *, T: float, key: jax.Array,
                 lane_tile: int = 512) -> jax.Array:
    """Pallas implementation of SoftmaxBody.forward.

    Args:
      outputs:   (B, A) float logits.
      T:         temperature (module hyperparameter).
      key:       jax.random key for the multinomial draw (deterministic).
      lane_tile: max lane-dim tile size (multiple of 128), v7x-VMEM-safe.

    Returns:
      (B, 1) int32 sampled action indices (torch returns int64).
    """
    B, A = outputs.shape

    # Precompute race noise G = 1/E, E ~ Exp(1).
    # TODO(synk): on real TPU this could use the in-kernel HW PRNG
    # (pltpu.prng_random_bits) to avoid the extra (B, A) HBM stream, but that
    # primitive has no CPU/interpret lowering.
    e_noise = jax.random.exponential(key, (B, A), dtype=jnp.float32)
    g = 1.0 / jnp.maximum(e_noise, jnp.float32(1e-30))

    # Lane-dim tile: full A for small inputs, otherwise a 128-multiple tile.
    ta = A if A <= lane_tile else lane_tile
    grid = (pl.cdiv(A, ta),)

    kernel = _make_softmax_body_kernel(float(T), A, ta)

    return pl.pallas_call(
        kernel,
        out_shape=jax.ShapeDtypeStruct((B, 1), jnp.int32),
        grid=grid,
        in_specs=[
            pl.BlockSpec((B, ta), lambda i: (0, i)),   # logits tile
            pl.BlockSpec((B, ta), lambda i: (0, i)),   # race-noise tile
        ],
        out_specs=pl.BlockSpec((B, 1), lambda i: (0, 0)),   # resident accumulator
        scratch_shapes=[
            pltpu.VMEM((B, 1), jnp.float32),   # running best key per row
            pltpu.VMEM((B, 1), jnp.int32),     # running best index per row
        ],
        compiler_params=pltpu.CompilerParams(
            dimension_semantics=("arbitrary",),      # carried argmax over A tiles
            vmem_limit_bytes=32 * 1024 * 1024,       # v7x-safe with headroom
        ),
    )(outputs.astype(jnp.float32), g)


if __name__ == "__main__":
    # SoftmaxBody(T=7) on small synthetic logits: batch of 2 states, 16 actions.
    T = 7.0
    B, A = 2, 16

    root = jax.random.PRNGKey(0)
    k_data, k_sample = jax.random.split(root)
    outputs = jax.random.normal(k_data, (B, A), dtype=jnp.float32)

    actions = softmax_body(outputs, T=T, key=k_sample)
    actions = jax.block_until_ready(actions)

    assert actions.shape == (B, 1)
    assert actions.dtype == jnp.int32
    assert bool(jnp.all((actions >= 0) & (actions < A)))

    print("KERNEL_OK")
</pallas_src>

<mosaic_0001>
module attributes {stable_mosaic.version = 11 : i64} {
  func.func @kernel(%arg0: i32, %arg1: memref<2x16xf32, #tpu.memory_space<vmem>>, %arg2: memref<2x16xf32, #tpu.memory_space<vmem>>, %arg3: memref<2x1xi32, #tpu.memory_space<vmem>>, %arg4: memref<2x1xf32, #tpu.memory_space<vmem>>, %arg5: memref<2x1xi32, #tpu.memory_space<vmem>>) attributes {dimension_semantics = [#tpu.dimension_semantics<arbitrary>], iteration_bounds = array<i64: 1>, scalar_prefetch = 0 : i64, scratch_operands = 2 : i64, tpu.core_type = #tpu.core_type<tc>, window_params = [{transform_indices = @transform_0, window_bounds = array<i64: 2, 16>}, {transform_indices = @transform_1, window_bounds = array<i64: 2, 16>}, {pipeline_mode = #tpu.pipeline_mode<synchronous>, transform_indices = @transform_2, window_bounds = array<i64: 2, 1>}]} {
    %c0_i32 = arith.constant 0 : i32
    %0 = arith.cmpi eq, %arg0, %c0_i32 : i32
    %1 = arith.extui %0 : i1 to i32
    %c0_i32_0 = arith.constant 0 : i32
    %2 = arith.cmpi ne, %1, %c0_i32_0 : i32
    scf.if %2 {
      %cst_22 = arith.constant 0xFF800000 : f32
      %42 = vector.broadcast %cst_22 : f32 to vector<2x1xf32>
      %c0_23 = arith.constant 0 : index
      %c0_24 = arith.constant 0 : index
      %43 = vector.load %arg4[%c0_23, %c0_24] : memref<2x1xf32, #tpu.memory_space<vmem>>, vector<2x1xf32>
      tpu.vector_store %arg4[%c0_23, %c0_24], %42 {strides = array<i32>} : memref<2x1xf32, #tpu.memory_space<vmem>>, vector<2x1xf32>,
      %c0_i32_25 = arith.constant 0 : i32
      %44 = vector.broadcast %c0_i32_25 : i32 to vector<2x1xi32>
      %c0_26 = arith.constant 0 : index
      %c0_27 = arith.constant 0 : index
      %45 = vector.load %arg5[%c0_26, %c0_27] : memref<2x1xi32, #tpu.memory_space<vmem>>, vector<2x1xi32>
      tpu.vector_store %arg5[%c0_26, %c0_27], %44 {strides = array<i32>} : memref<2x1xi32, #tpu.memory_space<vmem>>, vector<2x1xi32>,
    } else {
    }
    %c0 = arith.constant 0 : index
    %c0_1 = arith.constant 0 : index
    %3 = vector.load %arg1[%c0, %c0_1] : memref<2x16xf32, #tpu.memory_space<vmem>>, vector<2x16xf32>
    %cst = arith.constant 7.000000e+00 : f32
    %4 = vector.broadcast %cst : f32 to vector<2x16xf32>
    %5 = arith.mulf %3, %4 : vector<2x16xf32>
    %cst_2 = arith.constant dense<0xFF800000> : vector<16xf32>
    %6 = vector.multi_reduction <maximumf>, %5, %cst_2 [0] : vector<2x16xf32> to vector<16xf32>
    %7 = vector.shape_cast %6 : vector<16xf32> to vector<1x16xf32>
    %8 = vector.broadcast %7 : vector<1x16xf32> to vector<2x16xf32>
    %9 = arith.subf %5, %8 : vector<2x16xf32>
    %10 = math.exp %9 : vector<2x16xf32>
    %cst_3 = arith.constant dense<0.000000e+00> : vector<16xf32>
    %11 = vector.multi_reduction <add>, %10, %cst_3 [0] : vector<2x16xf32> to vector<16xf32>
    %12 = vector.shape_cast %11 : vector<16xf32> to vector<1x16xf32>
    %cst_4 = arith.constant 1.000000e+00 : f32
    %13 = vector.broadcast %cst_4 : f32 to vector<1x16xf32>
    %14 = arith.divf %13, %12 : vector<1x16xf32>
    %15 = vector.broadcast %14 : vector<1x16xf32> to vector<2x16xf32>
    %16 = arith.mulf %10, %15 : vector<2x16xf32>
    %c0_5 = arith.constant 0 : index
    %c0_6 = arith.constant 0 : index
    %17 = vector.load %arg2[%c0_5, %c0_6] : memref<2x16xf32, #tpu.memory_space<vmem>>, vector<2x16xf32>
    %18 = arith.mulf %16, %17 : vector<2x16xf32>
    %19 = tpu.iota {dimensions = array<i32: 1>} : vector<2x16xi32>
    %c16_i32 = arith.constant 16 : i32
    %20 = arith.muli %arg0, %c16_i32 : i32
    %21 = vector.broadcast %20 : i32 to vector<2x16xi32>
    %22 = arith.addi %19, %21 : vector<2x16xi32>
    %cst_7 = arith.constant dense<0xFF800000> : vector<2xf32>
    %23 = vector.multi_reduction <maximumf>, %18, %cst_7 [1] : vector<2x16xf32> to vector<2xf32>
    %24 = vector.shape_cast %23 : vector<2xf32> to vector<2x1xf32>
    %25 = vector.broadcast %24 : vector<2x1xf32> to vector<2x16xf32>
    %26 = arith.cmpf oge, %18, %25 : vector<2x16xf32>
    %c16_i32_8 = arith.constant 16 : i32
    %27 = vector.broadcast %c16_i32_8 : i32 to vector<2x16xi32>
    %28 = arith.select %26, %22, %27 : vector<2x16xi1>, vector<2x16xi32>
    %cst_9 = arith.constant dense<2147483647> : vector<2xi32>
    %29 = vector.multi_reduction <minsi>, %28, %cst_9 [1] : vector<2x16xi32> to vector<2xi32>
    %30 = vector.shape_cast %29 : vector<2xi32> to vector<2x1xi32>
    %c0_10 = arith.constant 0 : index
    %c0_11 = arith.constant 0 : index
    %31 = vector.load %arg4[%c0_10, %c0_11] : memref<2x1xf32, #tpu.memory_space<vmem>>, vector<2x1xf32>
    %32 = arith.cmpf ogt, %24, %31 : vector<2x1xf32>
    %c0_12 = arith.constant 0 : index
    %c0_13 = arith.constant 0 : index
    %33 = vector.load %arg5[%c0_12, %c0_13] : memref<2x1xi32, #tpu.memory_space<vmem>>, vector<2x1xi32>
    %34 = arith.select %32, %30, %33 : vector<2x1xi1>, vector<2x1xi32>
    %c0_14 = arith.constant 0 : index
    %c0_15 = arith.constant 0 : index
    %35 = vector.load %arg5[%c0_14, %c0_15] : memref<2x1xi32, #tpu.memory_space<vmem>>, vector<2x1xi32>
    tpu.vector_store %arg5[%c0_14, %c0_15], %34 {strides = array<i32>} : memref<2x1xi32, #tpu.memory_space<vmem>>, vector<2x1xi32>,
    %c0_16 = arith.constant 0 : index
    %c0_17 = arith.constant 0 : index
    %36 = vector.load %arg4[%c0_16, %c0_17] : memref<2x1xf32, #tpu.memory_space<vmem>>, vector<2x1xf32>
    %37 = arith.select %32, %24, %36 : vector<2x1xi1>, vector<2x1xf32>
    %c0_18 = arith.constant 0 : index
    %c0_19 = arith.constant 0 : index
    %38 = vector.load %arg4[%c0_18, %c0_19] : memref<2x1xf32, #tpu.memory_space<vmem>>, vector<2x1xf32>
    tpu.vector_store %arg4[%c0_18, %c0_19], %37 {strides = array<i32>} : memref<2x1xf32, #tpu.memory_space<vmem>>, vector<2x1xf32>,
    %c0_i32_20 = arith.constant 0 : i32
    %39 = arith.cmpi eq, %arg0, %c0_i32_20 : i32
    %40 = arith.extui %39 : i1 to i32
    %c0_i32_21 = arith.constant 0 : i32
    %41 = arith.cmpi ne, %40, %c0_i32_21 : i32
    scf.if %41 {
      %c0_22 = arith.constant 0 : index
      %c0_23 = arith.constant 0 : index
      %42 = vector.load %arg5[%c0_22, %c0_23] : memref<2x1xi32, #tpu.memory_space<vmem>>, vector<2x1xi32>
      %c0_24 = arith.constant 0 : index
      %c0_25 = arith.constant 0 : index
      %43 = vector.load %arg3[%c0_24, %c0_25] : memref<2x1xi32, #tpu.memory_space<vmem>>, vector<2x1xi32>
      tpu.vector_store %arg3[%c0_24, %c0_25], %42 {strides = array<i32>} : memref<2x1xi32, #tpu.memory_space<vmem>>, vector<2x1xi32>,
    } else {
    }
    return
  }
  func.func @transform_0(%arg0: i32) -> (i32, i32) {
    %c0_i32 = arith.constant 0 : i32
    %c0_i32_0 = arith.constant 0 : i32
    return %c0_i32, %arg0 : i32, i32
  }
  func.func @transform_1(%arg0: i32) -> (i32, i32) {
    %c0_i32 = arith.constant 0 : i32
    %c0_i32_0 = arith.constant 0 : i32
    return %c0_i32, %arg0 : i32, i32
  }
  func.func @transform_2(%arg0: i32) -> (i32, i32) {
    %c0_i32 = arith.constant 0 : i32
    %c0_i32_0 = arith.constant 0 : i32
    %c0_i32_1 = arith.constant 0 : i32
    return %c0_i32, %c0_i32_0 : i32, i32
  }
}

</mosaic_0001>

<bundles_post_ra>
// kernel: tpu_custom_call.1
= control target key start
LH: loop header
LB: loop body
LE: loop exit
PB: predicated region body
PF: predicated region fallthrough
CT: control target
= control target key end

     0   :  { %7 = vsyncpa [#allocation5], 0  ;;  %s130_s9 = smov [#allocation4]   ;;  %s177_s0 = inlined_call_operand.hbm [shape: f32[2,16], index: 0, kind: input, shape index: {}]   ;;  %s178_s1 = inlined_call_operand.vmem [shape: f32[2,16], index: 1, kind: input, shape index: {}]   ;;  %s179_s2 = inlined_call_operand.vmem [shape: s32[2,1], index: 2, kind: output, shape index: {}]  }
   0x1   :  { %s14_s10 = sshll.u32 %s130_s9, 4  ;;  %s106_s13 = scalar_lea.hbm %s177_s0, 32  ;;  %s15_s10 = int_to_ptr.vmem [resolvable:$true] %s14_s10 }
   0x2   :  { %p107_p0 = scmp.ne.s32.totalorder %s177_s0, %s106_s13  ;;  %p110_p1 = scmp.lt.u32.totalorder %s106_s13, %s177_s0 }
   0x4   :  { %p112_p2 = pnand %p110_p1, %p107_p0 }
   0x6   :  { %115 = shalt.err (!%p112_p2)
}
   0x7   :  { %s116_s18 = scalar_lea.vmem %s15_s10, 32  ;;  %p121_p4 = scmp.lt.s32.totalorder %s15_s10, %s15_s10 }
   0x8   :  { %p117_p3 = scmp.ne.s32.totalorder %s15_s10, %s116_s18  ;;  %p122_p5 = scmp.lt.s32.totalorder %s116_s18, %s116_s18 }
   0xa   :  { %p123_p6 = por %p122_p5, %p121_p4 }
   0xc   :  { %p124_p7 = pnand %p123_p6, %p117_p3 }
   0xe   :  { %127 = shalt.err (!%p124_p7)
}
   0xf   :  { %17 = dma.hbm_to_vmem [thread:$0]  %s177_s0, 32, %s15_s10, [#allocation5]  }
  0x10   :  { %128 = dma.done.wait [#allocation5], 32  }
  0x11   :  { %129 = vsyncadd [#allocation5], 4294967264  ;;  %vm27_vm0 = vcmask 1024   ;;  %v131_v0 = vmov -inf   ;;  %v30_v1 = vld [vmem:[#allocation4] sm:$0x3]  ;;  %v55_v25 = vlaneseq }
  0x12   :  { %28 = vst.msk [vmem:[#allocation2] sm:$0x3] %vm27_vm0, %v131_v0  ;;  %vm32_vm1 = vcmask 123904   ;;  %v31_v2 = vmul.f32 7.0, %v30_v1  ;;  %v53_v21 = vld [vmem:[%s178_s1] sm:$0x3] }
  0x13   :  { %v56_v27 = vand.u32 127, %v55_v25  ;;  %v132_v35 = vmov 0  }
  0x14   :  { %v33_v3 = vsel %vm32_vm1, %v31_v2, -inf  ;;  %29 = vst.msk [vmem:[#allocation3] sm:$0x3] %vm27_vm0, %v132_v35 }
  0x15   :  { %v34_v4 = vrot.slane %v33_v3, 4 }
  0x17   :  { %v35_v5 = vmax.f32 %v33_v3, %v34_v4 }
  0x19   :  { %v36_v6 = vrot.slane %v35_v5, 2  ;;  %v80_v26 = vld [vmem:[#allocation2] sm:$0x3] }
  0x1a   :  { %v86_v28 = vld [vmem:[#allocation2] sm:$0x3] }
  0x1b   :  { %v37_v7 = vmax.f32 %v35_v5, %v36_v6  ;;  %v82_v44 = vld [vmem:[#allocation3] sm:$0x3] }
  0x1d   :  { %v38_v8 = vrot.slane %v37_v7, 1 }
  0x1f   :  { %v39_v9 = vmax.f32 %v37_v7, %v38_v8 }
  0x21   :  { %v40_v10 = vsub.f32 %v31_v2, %v39_v9 }
  0x23   :  { %v41_v11 = vmul.f32 1.442695, %v40_v10 }
  0x25   :  { %102 = vpow2.f32 %v41_v11 }
  0x2f   :  { %v103_v12 = vpop.eup %102 }
  0x30   :  { %v43_v13 = vsel %vm32_vm1, %v103_v12, 0.0 }
  0x31   :  { %v44_v14 = vrot.slane %v43_v13, 4 }
  0x33   :  { %v45_v15 = vadd.f32 %v44_v14, %v43_v13 }
  0x35   :  { %v46_v16 = vrot.slane %v45_v15, 2 }
  0x37   :  { %v47_v17 = vadd.f32 %v46_v16, %v45_v15 }
  0x39   :  { %v48_v18 = vrot.slane %v47_v17, 1 }
  0x3b   :  { %v49_v19 = vadd.f32 %v48_v18, %v47_v17 }
  0x3d   :  { %104 = vrcp.f32 %v49_v19 }
  0x47   :  { %v105_v20 = vpop.eup %104 }
  0x48   :  { %v52_v22 = vmul.f32 %v105_v20, %v103_v12 }
  0x4a   :  { %v54_v23 = vmul.f32 %v53_v21, %v52_v22 }
  0x4c   :  { %v60_v24 = vsel %vm32_vm1, %v54_v23, -inf }
  0x4d   :  { %61 = vmax.xlane.f32.xlu0 %v60_v24 }
  0xda   :  { %v62_v29 = vpop.xlane.xlu0 %61 }
  0xdb   :  { %vm63_vm2 = vcmp.ge.f32.partialorder %v54_v23, %v62_v29  ;;  %vm81_vm3 = vcmp.gt.f32.partialorder %v62_v29, %v80_v26 }
  0xdc   :  { %v87_v30 = vsel %vm81_vm3, %v62_v29, %v86_v28  ;;  %v64_v31 = vsel %vm63_vm2, %v56_v27, 16 }
  0xdd   :  { %88 = vst.msk [vmem:[#allocation2] sm:$0x3] %vm27_vm0, %v87_v30  ;;  %v65_v32 = vsel %vm32_vm1, %v64_v31, 2147483647 }
  0xde   :  { %v67_v33 = vshra.s32 %v65_v32, 16  ;;  %v66_v36 = vand.u32 65535, %v65_v32 }
  0xe0   :  { %v69_v34 = vcvt.s32.f32 %v67_v33  ;;  %v68_v38 = vcvt.s32.f32 %v66_v36 }
  0xe2   :  { %70 = vmin.xlane.f32.xlu0 %v69_v34 }
 0x16f   :  { %v71_v37 = vpop.xlane.xlu0 %70 }
 0x170   :  { %vm72_vm4 = vcmp.eq.f32.partialorder %v69_v34, %v71_v37  ;;  %v77_v40 = vcvt.f32.s32 %v71_v37 }
 0x171   :  { %v73_v39 = vsel %vm72_vm4, %v68_v38, inf }
 0x172   :  { %74 = vmin.xlane.f32.xlu1 %v73_v39  ;;  %v78_v42 = vshll.u32 %v77_v40, 16 }
 0x1ff   :  { %v75_v41 = vpop.xlane.xlu1 %74 }
 0x200   :  { %v76_v43 = vcvt.f32.s32 %v75_v41 }
 0x202   :  { %v79_v45 = vadd.s32 %v78_v42, %v76_v43 }
 0x204   :  { %v83_v46 = vsel %vm81_vm3, %v79_v45, %v82_v44 }
 0x205   :  { %85 = vst.msk [vmem:[#allocation3] sm:$0x3] %vm27_vm0, %v83_v46 }
 0x20c   :  { %v92_v47 = vld [vmem:[#allocation3] sm:$0x3] }
 0x20d   :  { %93 = vst.msk [vmem:[%s179_s2] sm:$0x3] %vm27_vm0, %v92_v47 }
 0x20e   :  { %98 = vsyncpa [#allocation5], 1 }

</bundles_post_ra>
